<compile_context>
chip_gen: v7x
topology: tpu7x:2x2x1
jax: 0.10.0
libtpu: 0.0.40
codegen_flags: <defaults>
</compile_context>

<pallas_src>
import functools

import jax
import jax.numpy as jnp
from jax.experimental import pallas as pl
from jax.experimental.pallas import tpu as pltpu

_LANES = 128      # TPU lane count: class axis padded to this
_SUBLANES = 8     # f32 sublane count: batch axis padded to a multiple of this


def _prelu(x, alpha):
    # PyTorch nn.PReLU(): f(x) = max(0, x) + alpha * min(0, x)
    return jnp.maximum(x, 0.0) + alpha * jnp.minimum(x, 0.0)


def classification_net_kernel(x_ref, w0_ref, p_ref, out_ref, *, n_classes):
    """Single-invocation kernel, everything VMEM-resident.

    x_ref  : [B_pad, D]      bf16 flattened input (batch padded to 8)
    w0_ref : [D, H]          bf16 embedding Linear #1 weight (pre-transposed)
    p_ref  : [8, 128]        f32 packed small params:
               row 0, lanes 0:H -> b0
               row 1, lanes 0:H -> w1[:, 0]
               row 2, lanes 0:H -> w1[:, 1]
               row 3, lanes 0:4 -> [b1_0, b1_1, alpha0, alpha1]
               row 4, lanes 0:C -> wfc[0, :]
               row 5, lanes 0:C -> wfc[1, :]
               row 6, lanes 0:C -> bfc
    out_ref: [B_pad, 128]    f32 log-probabilities (lane-dense, pad lanes junk)
    """
    H = w0_ref.shape[1]

    # ---- embedding Linear(D, H): bf16 MXU matmul, f32 accumulation ----
    h = jnp.dot(x_ref[...], w0_ref[...], preferred_element_type=jnp.float32)
    h = h + p_ref[0:1, 0:H]                         # + b0
    h = _prelu(h, p_ref[3:4, 2:3])                  # embedding PReLU (alpha0)

    # ---- embedding Linear(H, 2): output dim 2 -> two lane reductions (VPU/XLU) ----
    e0 = jnp.sum(h * p_ref[1:2, 0:H], axis=-1, keepdims=True) + p_ref[3:4, 0:1]
    e1 = jnp.sum(h * p_ref[2:3, 0:H], axis=-1, keepdims=True) + p_ref[3:4, 1:2]

    # ---- ClassificationNet.nonlinear (PReLU, alpha1) ----
    a1 = p_ref[3:4, 3:4]
    e0 = _prelu(e0, a1)                             # [B_pad, 1]
    e1 = _prelu(e1, a1)

    # ---- fc1 Linear(2, n_classes): rank-1 expansion over lane-padded class axis ----
    logits = e0 * p_ref[4:5, :] + e1 * p_ref[5:6, :] + p_ref[6:7, :]   # [B_pad, 128]

    # ---- mask pad lanes, then stable log-softmax over the valid classes ----
    lane = jax.lax.broadcasted_iota(jnp.int32, logits.shape, 1)
    logits = jnp.where(lane < n_classes, logits, jnp.float32(-1e30))
    m = jnp.max(logits, axis=-1, keepdims=True)
    shifted = logits - m
    lse = jnp.log(jnp.sum(jnp.exp(shifted), axis=-1, keepdims=True))
    out_ref[...] = shifted - lse


def classification_net_forward(x_nchw, params):
    w0, b0, a0, w1, b1, a1, wfc, bfc = params
    B = x_nchw.shape[0]
    D = x_nchw.shape[1] * x_nchw.shape[2] * x_nchw.shape[3]
    H = w0.shape[1]
    C = wfc.shape[1]
    assert H <= _LANES and C <= _LANES, "packing assumes H, n_classes <= 128"

    # Flatten NCHW -> [B, D] (same row-major order as torch .view(B, -1)).
    # bf16 for the single big matmul: halves the dominant w0/x HBM DMA and is
    # the MXU-native input type; accumulation stays f32 inside the kernel.
    x = x_nchw.reshape(B, D)
    B_pad = ((B + _SUBLANES - 1) // _SUBLANES) * _SUBLANES
    x_pad = jnp.zeros((B_pad, D), jnp.bfloat16).at[:B].set(x.astype(jnp.bfloat16))
    w0_bf16 = w0.astype(jnp.bfloat16)

    # Pack every tiny parameter into one f32 [8, 128] tile -> one DMA, not seven.
    p = jnp.zeros((_SUBLANES, _LANES), jnp.float32)
    p = p.at[0, :H].set(b0.reshape(H))
    p = p.at[1, :H].set(w1[:, 0])
    p = p.at[2, :H].set(w1[:, 1])
    p = p.at[3, 0].set(b1.reshape(2)[0])
    p = p.at[3, 1].set(b1.reshape(2)[1])
    p = p.at[3, 2].set(a0.reshape(()))
    p = p.at[3, 3].set(a1.reshape(()))
    p = p.at[4, :C].set(wfc[0])
    p = p.at[5, :C].set(wfc[1])
    p = p.at[6, :C].set(bfc.reshape(C))

    vmem = pl.BlockSpec(memory_space=pltpu.MemorySpace.VMEM)
    out_pad = pl.pallas_call(
        functools.partial(classification_net_kernel, n_classes=C),
        out_shape=jax.ShapeDtypeStruct((B_pad, _LANES), jnp.float32),
        in_specs=[vmem, vmem, vmem],
        out_specs=vmem,
    )(x_pad, w0_bf16, p)
    # TODO(synk): for large serving batches add a "parallel" batch grid axis so
    #             v7x's two TensorCores split the work; pointless at B=2.
    return out_pad[:B, :C]


def init_params(key, D, H, n_classes):
    """Deterministic init mimicking PyTorch Linear/PReLU defaults."""
    ks = jax.random.split(key, 6)

    def linear(kw, kb, fan_in, fan_out):
        bound = 1.0 / jnp.sqrt(fan_in)
        # PyTorch weight is [out, in]; store transposed [in, out] for the kernel.
        w = jax.random.uniform(kw, (fan_in, fan_out), jnp.float32, -bound, bound)
        b = jax.random.uniform(kb, (1, fan_out), jnp.float32, -bound, bound)
        return w, b

    w0, b0 = linear(ks[0], ks[1], D, H)            # embedding Linear(D, H)
    w1, b1 = linear(ks[2], ks[3], H, 2)            # embedding Linear(H, 2)
    wfc_t, bfc = linear(ks[4], ks[5], 2, n_classes)  # fc1 = Linear(2, n_classes)
    a0 = jnp.full((1, 1), 0.25, jnp.float32)       # nn.PReLU() default init
    a1 = jnp.full((1, 1), 0.25, jnp.float32)       # self.nonlinear PReLU
    return (w0, b0, a0, w1, b1, a1, wfc_t, bfc)


def reference_forward(x_nchw, params):
    """Plain-JAX reference (same bf16 cast for the big matmul)."""
    w0, b0, a0, w1, b1, a1, wfc, bfc = params
    B = x_nchw.shape[0]
    x = x_nchw.reshape(B, -1).astype(jnp.bfloat16)
    h = jnp.dot(x, w0.astype(jnp.bfloat16), preferred_element_type=jnp.float32) + b0
    h = jnp.maximum(h, 0.0) + a0 * jnp.minimum(h, 0.0)
    emb = jnp.dot(h, w1) + b1
    emb = jnp.maximum(emb, 0.0) + a1 * jnp.minimum(emb, 0.0)
    logits = jnp.dot(emb, wfc) + bfc
    return jax.nn.log_softmax(logits, axis=-1)


if __name__ == "__main__":
    key = jax.random.PRNGKey(0)
    k_x, k_p = jax.random.split(key)

    B, C_in, HH, WW = 2, 4, 16, 16
    n_classes = 10
    hidden = 64
    D = C_in * HH * WW

    x = jax.random.normal(k_x, (B, C_in, HH, WW), jnp.float32)
    params = init_params(k_p, D, hidden, n_classes)

    out = classification_net_forward(x, params)
    out = jax.block_until_ready(out)

    assert out.shape == (B, n_classes)
    assert out.dtype == jnp.float32
    # log-softmax rows must (approximately) exp-sum to 1
    assert jnp.allclose(jnp.sum(jnp.exp(out), axis=-1), 1.0, atol=1e-4)
    # match the plain-JAX reference (same bf16 matmul inputs, f32 accumulation)
    ref = reference_forward(x, params)
    assert jnp.allclose(out, ref, atol=1e-3, rtol=1e-3)

    print("KERNEL_OK")
</pallas_src>

<mosaic_0001>
module attributes {stable_mosaic.version = 11 : i64} {
  func.func @classification_net_kernel(%arg0: memref<8x1024xbf16, #tpu.memory_space<vmem>>, %arg1: memref<1024x64xbf16, #tpu.memory_space<vmem>>, %arg2: memref<8x128xf32, #tpu.memory_space<vmem>>, %arg3: memref<8x128xf32, #tpu.memory_space<vmem>>) attributes {dimension_semantics = [], scalar_prefetch = 0 : i64, scratch_operands = 0 : i64, tpu.core_type = #tpu.core_type<tc>} {
    %c0 = arith.constant 0 : index
    %c0_0 = arith.constant 0 : index
    %0 = vector.load %arg0[%c0, %c0_0] : memref<8x1024xbf16, #tpu.memory_space<vmem>>, vector<8x1024xbf16>
    %c0_1 = arith.constant 0 : index
    %c0_2 = arith.constant 0 : index
    %1 = vector.load %arg1[%c0_1, %c0_2] : memref<1024x64xbf16, #tpu.memory_space<vmem>>, vector<1024x64xbf16>
    %cst = arith.constant dense<0.000000e+00> : vector<8x64xf32>
    %2 = tpu.matmul %0, %1, %cst {dimension_numbers = #tpu.dot_dimension_numbers<[1], [0], [0], [1], [0, 0, 1, 1], [], []>} : vector<8x1024xbf16>, vector<1024x64xbf16>, vector<8x64xf32> -> vector<8x64xf32>
    %c0_3 = arith.constant 0 : index
    %c0_4 = arith.constant 0 : index
    %3 = vector.load %arg2[%c0_3, %c0_4] : memref<8x128xf32, #tpu.memory_space<vmem>>, vector<1x64xf32>
    %4 = vector.broadcast %3 : vector<1x64xf32> to vector<8x64xf32>
    %5 = arith.addf %2, %4 : vector<8x64xf32>
    %c3 = arith.constant 3 : index
    %c2 = arith.constant 2 : index
    %6 = vector.load %arg2[%c3, %c2] : memref<8x128xf32, #tpu.memory_space<vmem>>, vector<1x1xf32>
    %cst_5 = arith.constant 0.000000e+00 : f32
    %7 = vector.broadcast %cst_5 : f32 to vector<8x64xf32>
    %8 = arith.maximumf %5, %7 : vector<8x64xf32>
    %cst_6 = arith.constant 0.000000e+00 : f32
    %9 = vector.broadcast %cst_6 : f32 to vector<8x64xf32>
    %10 = arith.minimumf %5, %9 : vector<8x64xf32>
    %11 = vector.broadcast %6 : vector<1x1xf32> to vector<8x64xf32>
    %12 = arith.mulf %11, %10 : vector<8x64xf32>
    %13 = arith.addf %8, %12 : vector<8x64xf32>
    %c1 = arith.constant 1 : index
    %c0_7 = arith.constant 0 : index
    %14 = vector.load %arg2[%c1, %c0_7] : memref<8x128xf32, #tpu.memory_space<vmem>>, vector<1x64xf32>
    %15 = vector.broadcast %14 : vector<1x64xf32> to vector<8x64xf32>
    %16 = arith.mulf %13, %15 : vector<8x64xf32>
    %cst_8 = arith.constant dense<0.000000e+00> : vector<8xf32>
    %17 = vector.multi_reduction <add>, %16, %cst_8 [1] : vector<8x64xf32> to vector<8xf32>
    %18 = vector.shape_cast %17 : vector<8xf32> to vector<8x1xf32>
    %c3_9 = arith.constant 3 : index
    %c0_10 = arith.constant 0 : index
    %19 = vector.load %arg2[%c3_9, %c0_10] : memref<8x128xf32, #tpu.memory_space<vmem>>, vector<1x1xf32>
    %20 = vector.broadcast %19 : vector<1x1xf32> to vector<8x1xf32>
    %21 = arith.addf %18, %20 : vector<8x1xf32>
    %c2_11 = arith.constant 2 : index
    %c0_12 = arith.constant 0 : index
    %22 = vector.load %arg2[%c2_11, %c0_12] : memref<8x128xf32, #tpu.memory_space<vmem>>, vector<1x64xf32>
    %23 = vector.broadcast %22 : vector<1x64xf32> to vector<8x64xf32>
    %24 = arith.mulf %13, %23 : vector<8x64xf32>
    %cst_13 = arith.constant dense<0.000000e+00> : vector<8xf32>
    %25 = vector.multi_reduction <add>, %24, %cst_13 [1] : vector<8x64xf32> to vector<8xf32>
    %26 = vector.shape_cast %25 : vector<8xf32> to vector<8x1xf32>
    %c3_14 = arith.constant 3 : index
    %c1_15 = arith.constant 1 : index
    %27 = vector.load %arg2[%c3_14, %c1_15] : memref<8x128xf32, #tpu.memory_space<vmem>>, vector<1x1xf32>
    %28 = vector.broadcast %27 : vector<1x1xf32> to vector<8x1xf32>
    %29 = arith.addf %26, %28 : vector<8x1xf32>
    %c3_16 = arith.constant 3 : index
    %c3_17 = arith.constant 3 : index
    %30 = vector.load %arg2[%c3_16, %c3_17] : memref<8x128xf32, #tpu.memory_space<vmem>>, vector<1x1xf32>
    %cst_18 = arith.constant 0.000000e+00 : f32
    %31 = vector.broadcast %cst_18 : f32 to vector<8x1xf32>
    %32 = arith.maximumf %21, %31 : vector<8x1xf32>
    %cst_19 = arith.constant 0.000000e+00 : f32
    %33 = vector.broadcast %cst_19 : f32 to vector<8x1xf32>
    %34 = arith.minimumf %21, %33 : vector<8x1xf32>
    %35 = vector.broadcast %30 : vector<1x1xf32> to vector<8x1xf32>
    %36 = arith.mulf %35, %34 : vector<8x1xf32>
    %37 = arith.addf %32, %36 : vector<8x1xf32>
    %cst_20 = arith.constant 0.000000e+00 : f32
    %38 = vector.broadcast %cst_20 : f32 to vector<8x1xf32>
    %39 = arith.maximumf %29, %38 : vector<8x1xf32>
    %cst_21 = arith.constant 0.000000e+00 : f32
    %40 = vector.broadcast %cst_21 : f32 to vector<8x1xf32>
    %41 = arith.minimumf %29, %40 : vector<8x1xf32>
    %42 = vector.broadcast %30 : vector<1x1xf32> to vector<8x1xf32>
    %43 = arith.mulf %42, %41 : vector<8x1xf32>
    %44 = arith.addf %39, %43 : vector<8x1xf32>
    %c4 = arith.constant 4 : index
    %c0_22 = arith.constant 0 : index
    %45 = vector.load %arg2[%c4, %c0_22] : memref<8x128xf32, #tpu.memory_space<vmem>>, vector<1x128xf32>
    %46 = vector.broadcast %37 : vector<8x1xf32> to vector<8x128xf32>
    %47 = vector.broadcast %45 : vector<1x128xf32> to vector<8x128xf32>
    %48 = arith.mulf %46, %47 : vector<8x128xf32>
    %c5 = arith.constant 5 : index
    %c0_23 = arith.constant 0 : index
    %49 = vector.load %arg2[%c5, %c0_23] : memref<8x128xf32, #tpu.memory_space<vmem>>, vector<1x128xf32>
    %50 = vector.broadcast %44 : vector<8x1xf32> to vector<8x128xf32>
    %51 = vector.broadcast %49 : vector<1x128xf32> to vector<8x128xf32>
    %52 = arith.mulf %50, %51 : vector<8x128xf32>
    %53 = arith.addf %48, %52 : vector<8x128xf32>
    %c6 = arith.constant 6 : index
    %c0_24 = arith.constant 0 : index
    %54 = vector.load %arg2[%c6, %c0_24] : memref<8x128xf32, #tpu.memory_space<vmem>>, vector<1x128xf32>
    %55 = vector.broadcast %54 : vector<1x128xf32> to vector<8x128xf32>
    %56 = arith.addf %53, %55 : vector<8x128xf32>
    %57 = tpu.iota {dimensions = array<i32: 1>} : vector<8x128xi32>
    %c10_i32 = arith.constant 10 : i32
    %58 = vector.broadcast %c10_i32 : i32 to vector<8x128xi32>
    %59 = arith.cmpi slt, %57, %58 : vector<8x128xi32>
    %cst_25 = arith.constant -1.000000e+30 : f32
    %60 = vector.broadcast %cst_25 : f32 to vector<8x128xf32>
    %61 = arith.select %59, %56, %60 : vector<8x128xi1>, vector<8x128xf32>
    %cst_26 = arith.constant dense<0xFF800000> : vector<8xf32>
    %62 = vector.multi_reduction <maximumf>, %61, %cst_26 [1] : vector<8x128xf32> to vector<8xf32>
    %63 = vector.shape_cast %62 : vector<8xf32> to vector<8x1xf32>
    %64 = vector.broadcast %63 : vector<8x1xf32> to vector<8x128xf32>
    %65 = arith.subf %61, %64 : vector<8x128xf32>
    %66 = math.exp %65 : vector<8x128xf32>
    %cst_27 = arith.constant dense<0.000000e+00> : vector<8xf32>
    %67 = vector.multi_reduction <add>, %66, %cst_27 [1] : vector<8x128xf32> to vector<8xf32>
    %68 = vector.shape_cast %67 : vector<8xf32> to vector<8x1xf32>
    %69 = math.log %68 : vector<8x1xf32>
    %70 = vector.broadcast %69 : vector<8x1xf32> to vector<8x128xf32>
    %71 = arith.subf %65, %70 : vector<8x128xf32>
    %c0_28 = arith.constant 0 : index
    %c0_29 = arith.constant 0 : index
    %72 = vector.load %arg3[%c0_28, %c0_29] : memref<8x128xf32, #tpu.memory_space<vmem>>, vector<8x128xf32>
    tpu.vector_store %arg3[%c0_28, %c0_29], %71 {strides = array<i32>} : memref<8x128xf32, #tpu.memory_space<vmem>>, vector<8x128xf32>,
    return
  }
}

</mosaic_0001>

<bundles_post_ra>
// kernel: tpu_custom_call.1
= control target key start
LH: loop header
LB: loop body
LE: loop exit
PB: predicated region body
PF: predicated region fallthrough
CT: control target
= control target key end

     0   :  { %s1386_s0 = inlined_call_operand.vmem [shape: bf16[8,1024], index: 0, kind: input, shape index: {}]   ;;  %s1387_s1 = inlined_call_operand.vmem [shape: bf16[1024,64], index: 1, kind: input, shape index: {}]   ;;  %s1388_s2 = inlined_call_operand.vmem [shape: f32[8,128], index: 2, kind: input, shape index: {}]   ;;  %s1389_s3 = inlined_call_operand.hbm [shape: f32[8,128], index: 3, kind: output, shape index: {}]  }
   0x1   :  { %v1020_v0 = vld [vmem:[%s1387_s1 + $0x40] sm:$0xff]   ;;  %v1024_v4 = vld [vmem:[%s1387_s1 + $0x48] sm:$0xff]   ;;  %v1028_v8 = vld [vmem:[%s1387_s1 + $0x50] sm:$0xff]  }
   0x2   :  { %v1021_v1 = vld [vmem:[%s1387_s1 + $0xc0] sm:$0xff]   ;;  %921 = vmatprep.subr.bf16.mxu0 %v1020_v0  ;;  %v1025_v5 = vld [vmem:[%s1387_s1 + $0xc8] sm:$0xff]   ;;  %v1029_v9 = vld [vmem:[%s1387_s1 + $0xd0] sm:$0xff]  }
   0x3   :  { %v1022_v2 = vld [vmem:[%s1387_s1] sm:$0xff]   ;;  %943 = vmatprep.subr.bf16.mxu1 %v1021_v1  ;;  %v1026_v6 = vld [vmem:[%s1387_s1 + $0x8] sm:$0xff]   ;;  %v1030_v10 = vld [vmem:[%s1387_s1 + $0x10] sm:$0xff]  }
   0x4   :  { %v1023_v3 = vld [vmem:[%s1387_s1 + $0x80] sm:$0xff]   ;;  %922 = vmatpush3.bf16.msra.mxu0 %v1022_v2  ;;  %v1027_v7 = vld [vmem:[%s1387_s1 + $0x88] sm:$0xff]   ;;  %v1031_v11 = vld [vmem:[%s1387_s1 + $0x90] sm:$0xff]  }
   0x5   :  { %944 = vmatpush3.bf16.msra.mxu1 %v1023_v3  ;;  %923 = vmatprep.subr.bf16.mxu0 %v1024_v4  ;;  %v1032_v12 = vld [vmem:[%s1387_s1 + $0x58] sm:$0xff]   ;;  %v1036_v16 = vld [vmem:[%s1387_s1 + $0x60] sm:$0xff]   ;;  %v1040_v20 = vld [vmem:[%s1387_s1 + $0x68] sm:$0xff]  }
   0x6   :  { %945 = vmatprep.subr.bf16.mxu1 %v1025_v5  ;;  %v1033_v13 = vld [vmem:[%s1387_s1 + $0xd8] sm:$0xff]   ;;  %v1037_v17 = vld [vmem:[%s1387_s1 + $0xe0] sm:$0xff]   ;;  %v1041_v21 = vld [vmem:[%s1387_s1 + $0xe8] sm:$0xff]  }
   0x7   :  { %v1034_v14 = vld [vmem:[%s1387_s1 + $0x18] sm:$0xff]   ;;  %v1038_v18 = vld [vmem:[%s1387_s1 + $0x20] sm:$0xff]   ;;  %v1042_v22 = vld [vmem:[%s1387_s1 + $0x28] sm:$0xff]  }
   0x8   :  { %924 = vmatpush3.bf16.msra.mxu0 %v1026_v6  ;;  %v1035_v15 = vld [vmem:[%s1387_s1 + $0x98] sm:$0xff]   ;;  %v1039_v19 = vld [vmem:[%s1387_s1 + $0xa0] sm:$0xff]   ;;  %v1043_v23 = vld [vmem:[%s1387_s1 + $0xa8] sm:$0xff]  }
   0x9   :  { %946 = vmatpush3.bf16.msra.mxu1 %v1027_v7  ;;  %925 = vmatprep.subr.bf16.mxu0 %v1028_v8  ;;  %v1044_v24 = vld [vmem:[%s1387_s1 + $0x70] sm:$0xff]   ;;  %v1048_v28 = vld [vmem:[%s1387_s1 + $0x78] sm:$0xff]   ;;  %v16_v32 = vld [vmem:[%s1386_s0] sm:$0xff] }
   0xa   :  { %947 = vmatprep.subr.bf16.mxu1 %v1029_v9  ;;  %v1045_v25 = vld [vmem:[%s1387_s1 + $0xf0] sm:$0xff]   ;;  %v1049_v29 = vld [vmem:[%s1387_s1 + $0xf8] sm:$0xff]   ;;  %v17_v33 = vld [vmem:[%s1386_s0 + $0x8] sm:$0xff]  ;;  %v844_v34 = vcombine.low %v16_v32, %v16_v32  ;;  %v845_v35 = vcombine.high %v16_v32, %v16_v32 }
   0xb   :  { %v1046_v26 = vld [vmem:[%s1387_s1 + $0x30] sm:$0xff]   ;;  %v1050_v30 = vld [vmem:[%s1387_s1 + $0x38] sm:$0xff]   ;;  %v846_v36 = vcombine.low %v17_v33, %v17_v33  ;;  %v847_v37 = vcombine.high %v17_v33, %v17_v33  ;;  %v1056_v38 = vld [vmem:[%s1387_s1 + $0x140] sm:$0xff]  }
   0xc   :  { %926 = vmatpush3.bf16.msra.mxu0 %v1030_v10  ;;  %v1047_v27 = vld [vmem:[%s1387_s1 + $0xb0] sm:$0xff]   ;;  %v1051_v31 = vld [vmem:[%s1387_s1 + $0xb8] sm:$0xff]   ;;  %v1057_v39 = vld [vmem:[%s1387_s1 + $0x1c0] sm:$0xff]   ;;  %597 = vmatprep.mubr.bf16.mxu0 %v845_v35 }
   0xd   :  { %948 = vmatpush3.bf16.msra.mxu1 %v1031_v11  ;;  %927 = vmatprep.subr.bf16.mxu0 %v1032_v12  ;;  %v1058_v40 = vld [vmem:[%s1387_s1 + $0x100] sm:$0xff]   ;;  %v1060_v42 = vld [vmem:[%s1387_s1 + $0x148] sm:$0xff]   ;;  %v1064_v46 = vld [vmem:[%s1387_s1 + $0x150] sm:$0xff]  }
   0xe   :  { %949 = vmatprep.subr.bf16.mxu1 %v1033_v13  ;;  %637 = vmatprep.mubr.bf16.mxu1 %v847_v37  ;;  %v1059_v41 = vld [vmem:[%s1387_s1 + $0x180] sm:$0xff]   ;;  %v1061_v43 = vld [vmem:[%s1387_s1 + $0x1c8] sm:$0xff]   ;;  %v1065_v47 = vld [vmem:[%s1387_s1 + $0x1d0] sm:$0xff]  }
   0xf   :  { %v1062_v44 = vld [vmem:[%s1387_s1 + $0x108] sm:$0xff]   ;;  %v1066_v48 = vld [vmem:[%s1387_s1 + $0x110] sm:$0xff]   ;;  %v1068_v50 = vld [vmem:[%s1387_s1 + $0x158] sm:$0xff]  }
  0x10   :  { %928 = vmatpush3.bf16.msra.mxu0 %v1034_v14  ;;  %v1063_v45 = vld [vmem:[%s1387_s1 + $0x188] sm:$0xff]   ;;  %v1067_v49 = vld [vmem:[%s1387_s1 + $0x190] sm:$0xff]   ;;  %v1069_v51 = vld [vmem:[%s1387_s1 + $0x1d8] sm:$0xff]  }
  0x11   :  { %950 = vmatpush3.bf16.msra.mxu1 %v1035_v15  ;;  %929 = vmatprep.subr.bf16.mxu0 %v1036_v16  ;;  %v1070_v52 = vld [vmem:[%s1387_s1 + $0x118] sm:$0xff]   ;;  %v1072_v54 = vld [vmem:[%s1387_s1 + $0x160] sm:$0xff]   ;;  %v1076_v58 = vld [vmem:[%s1387_s1 + $0x168] sm:$0xff]  }
  0x12   :  { %951 = vmatprep.subr.bf16.mxu1 %v1037_v17  ;;  %v1071_v53 = vld [vmem:[%s1387_s1 + $0x198] sm:$0xff]   ;;  %v1073_v55 = vld [vmem:[%s1387_s1 + $0x1e0] sm:$0xff]   ;;  %v1077_v59 = vld [vmem:[%s1387_s1 + $0x1e8] sm:$0xff]  }
  0x13   :  { %v1074_v56 = vld [vmem:[%s1387_s1 + $0x120] sm:$0xff]   ;;  %v1078_v60 = vld [vmem:[%s1387_s1 + $0x128] sm:$0xff]   ;;  %v1080_v62 = vld [vmem:[%s1387_s1 + $0x170] sm:$0xff]  }
  0x14   :  { %930 = vmatpush3.bf16.msra.mxu0 %v1038_v18  ;;  %v1075_v57 = vld [vmem:[%s1387_s1 + $0x1a0] sm:$0xff]   ;;  %v1079_v61 = vld [vmem:[%s1387_s1 + $0x1a8] sm:$0xff]   ;;  %v1081_v63 = vld [vmem:[%s1387_s1 + $0x1f0] sm:$0xff]  }
  0x15   :  { %952 = vmatpush3.bf16.msra.mxu1 %v1039_v19  ;;  %931 = vmatprep.subr.bf16.mxu0 %v1040_v20  ;;  %v1082_v0 = vld [vmem:[%s1387_s1 + $0x130] sm:$0xff]   ;;  %v1084_v2 = vld [vmem:[%s1387_s1 + $0x178] sm:$0xff]   ;;  %v725_v10 = vld [vmem:[%s1388_s2 + $0x3] sm:$0x1] }
  0x16   :  { %953 = vmatprep.subr.bf16.mxu1 %v1041_v21  ;;  %v1083_v1 = vld [vmem:[%s1387_s1 + $0x1b0] sm:$0xff]   ;;  %v1085_v3 = vld [vmem:[%s1387_s1 + $0x1f8] sm:$0xff]  }
  0x17   :  { %v1086_v4 = vld [vmem:[%s1387_s1 + $0x138] sm:$0xff]   ;;  %v18_v6 = vld [vmem:[%s1386_s0 + $0x10] sm:$0xff] }
  0x18   :  { %932 = vmatpush3.bf16.msra.mxu0 %v1042_v22  ;;  %v1087_v5 = vld [vmem:[%s1387_s1 + $0x1b8] sm:$0xff]   ;;  %v848_v7 = vcombine.low %v18_v6, %v18_v6  ;;  %v849_v8 = vcombine.high %v18_v6, %v18_v6 }
  0x19   :  { %954 = vmatpush3.bf16.msra.mxu1 %v1043_v23  ;;  %933 = vmatprep.subr.bf16.mxu0 %v1044_v24  ;;  %v19_v9 = vld [vmem:[%s1386_s0 + $0x18] sm:$0xff] }
  0x1a   :  { %955 = vmatprep.subr.bf16.mxu1 %v1045_v25 }
  0x1c   :  { %934 = vmatpush3.bf16.msra.mxu0 %v1046_v26 }
  0x1d   :  { %956 = vmatpush3.bf16.msra.mxu1 %v1047_v27  ;;  %935 = vmatprep.subr.bf16.mxu0 %v1048_v28 }
  0x1e   :  { %957 = vmatprep.subr.bf16.mxu1 %v1049_v29 }
  0x20   :  { %936 = vmatpush3.bf16.msra.mxu0 %v1050_v30 }
  0x21   :  { %958 = vmatpush3.bf16.msra.mxu1 %v1051_v31  ;;  %965 = vmatprep.subr.bf16.mxu0 %v1056_v38 }
  0x22   :  { %987 = vmatprep.subr.bf16.mxu1 %v1057_v39 }
  0x23   :  { %598 = vmatmul.mubr.bf16.vlgmr.msra.gmra.mrb[0].mxu0 %v844_v34 }
  0x24   :  { %638 = vmatmul.mubr.bf16.vlgmr.msra.gmra.mrb[0].mxu1 %v846_v36  ;;  %966 = vmatpush3.bf16.msra.mxu0 %v1058_v40 }
  0x25   :  { %988 = vmatpush3.bf16.msra.mxu1 %v1059_v41  ;;  %967 = vmatprep.subr.bf16.mxu0 %v1060_v42 }
  0x26   :  { %989 = vmatprep.subr.bf16.mxu1 %v1061_v43 }
  0x28   :  { %968 = vmatpush3.bf16.msra.mxu0 %v1062_v44 }
  0x29   :  { %990 = vmatpush3.bf16.msra.mxu1 %v1063_v45  ;;  %969 = vmatprep.subr.bf16.mxu0 %v1064_v46 }
  0x2a   :  { %991 = vmatprep.subr.bf16.mxu1 %v1065_v47 }
  0x2c   :  { %970 = vmatpush3.bf16.msra.mxu0 %v1066_v48 }
  0x2d   :  { %992 = vmatpush3.bf16.msra.mxu1 %v1067_v49  ;;  %971 = vmatprep.subr.bf16.mxu0 %v1068_v50 }
  0x2e   :  { %993 = vmatprep.subr.bf16.mxu1 %v1069_v51 }
  0x30   :  { %972 = vmatpush3.bf16.msra.mxu0 %v1070_v52 }
  0x31   :  { %994 = vmatpush3.bf16.msra.mxu1 %v1071_v53  ;;  %973 = vmatprep.subr.bf16.mxu0 %v1072_v54 }
  0x32   :  { %995 = vmatprep.subr.bf16.mxu1 %v1073_v55 }
  0x34   :  { %974 = vmatpush3.bf16.msra.mxu0 %v1074_v56 }
  0x35   :  { %996 = vmatpush3.bf16.msra.mxu1 %v1075_v57  ;;  %975 = vmatprep.subr.bf16.mxu0 %v1076_v58 }
  0x36   :  { %997 = vmatprep.subr.bf16.mxu1 %v1077_v59 }
  0x38   :  { %976 = vmatpush3.bf16.msra.mxu0 %v1078_v60 }
  0x39   :  { %998 = vmatpush3.bf16.msra.mxu1 %v1079_v61  ;;  %977 = vmatprep.subr.bf16.mxu0 %v1080_v62 }
  0x3a   :  { %999 = vmatprep.subr.bf16.mxu1 %v1081_v63 }
  0x3c   :  { %978 = vmatpush3.bf16.msra.mxu0 %v1082_v0 }
  0x3d   :  { %1000 = vmatpush3.bf16.msra.mxu1 %v1083_v1  ;;  %979 = vmatprep.subr.bf16.mxu0 %v1084_v2 }
  0x3e   :  { %1001 = vmatprep.subr.bf16.mxu1 %v1085_v3 }
  0x3f   :  { %8 = vsyncpa [#allocation3], 0  ;;  %v850_v11 = vcombine.low %v19_v9, %v19_v9  ;;  %v851_v12 = vcombine.high %v19_v9, %v19_v9  ;;  %677 = vmatprep.mubr.bf16.mxu0 %v849_v8  ;;  %s1120_s1 = smov 126   ;;  %v843_v16 = vld [vmem:[%s1388_s2] ss:$0 sm:$0xff]  ;;  %vm742_vm0 = vcmask 523264   ;;  %v746_v50 = vlaneseq }
  0x40   :  { %980 = vmatpush3.bf16.msra.mxu0 %v1086_v4  ;;  %729 = vrot.lane.b32.xlu0 %v725_v10, %s1120_s1  ;;  %v917_v43 = vld [vmem:[%s1388_s2 + $0x2] ss:$0 sm:$0xff]  ;;  %v916_v44 = vld [vmem:[%s1388_s2 + $0x1] ss:$0 sm:$0xff]  ;;  %s1121_s21 = smov 3   ;;  %s1122_s22 = smov 2  }
  0x41   :  { %1002 = vmatpush3.bf16.msra.mxu1 %v1087_v5  ;;  %717 = vmatprep.mubr.bf16.mxu1 %v851_v12  ;;  %v747_v51 = vshrl.u32 %v746_v50, 7  ;;  %v1123_v60 = vmov 0   ;;  %v1124_v61 = vmov 1   ;;  %s1125_s23 = smov 125   ;;  %v918_v8 = vld [vmem:[%s1388_s2 + $0x4] ss:$0 sm:$0xff] }
  0x42   :  { %1018 = vset.pattern.permute.xlu1 %v1123_v60  ;;  %1019 = vset.pattern.permute.xlu0 %v1124_v61  ;;  %v815_v12 = vand.u32 127, %v746_v50  ;;  %s1126_s30 = smov [#allocation2]  }
  0x43   :  { %678 = vmatmul.mubr.bf16.vlgmr.msra.gmra.mrb[4].mxu0 %v848_v7  ;;  %v748_v52 = vsub.s32 0, %v747_v51  ;;  %s835_s4 = sshll.u32 %s1126_s30, 4  ;;  %s836_s4 = int_to_ptr.vmem [resolvable:$true] %s835_s4 }
  0x44   :  { %718 = vmatmul.mubr.bf16.vlgmr.msra.gmra.mrb[4].mxu1 %v850_v11  ;;  %vm816_vm1 = vcmp.lt.s32.totalorder %v815_v12, 10  ;;  %p1101_p1 = scmp.lt.s32.totalorder %s836_s4, %s836_s4 }
  0x45   :  { %v749_v53 = vrot.slane %v725_v10, %v748_v52  ;;  %v919_v10 = vld [vmem:[%s1388_s2 + $0x5] ss:$0 sm:$0xff] }
  0xb2   :  { %v730_v13 = vpop.permute.xlu0 %729 }
  0xb3   :  { %1009 = vpush %v730_v13 }
  0xe4   :  { %s1010_s16 = spop %1009 }
  0xe5   :  { %v732_v39 = vstv %s1010_s16 }
  0xf6   :  { %v937_v14 = vpop.f32.mrb[0].mxu0 }
  0xf7   :  { %v959_v15 = vpop.f32.mrb[0].mxu1  ;;  %v938_v17 = vpop.f32.mrb[1].mxu0 }
  0xf8   :  { %v960_v18 = vpop.f32.mrb[1].mxu1  ;;  %v939_v19 = vadd.f32 %v938_v17, %v937_v14  ;;  %v940_v21 = vpop.f32.mrb[2].mxu0 }
  0xf9   :  { %v961_v20 = vadd.f32 %v960_v18, %v959_v15  ;;  %v962_v22 = vpop.f32.mrb[2].mxu1  ;;  %v941_v23 = vpop.f32.mrb[3].mxu0  ;;  %v920_v15 = vld [vmem:[%s1388_s2 + $0x6] ss:$0 sm:$0xff]  ;;  %s1096_s2 = scalar_lea.vmem %s836_s4, 128 }
  0xfa   :  { %v963_v24 = vpop.f32.mrb[3].mxu1  ;;  %v600_v25 = vadd.f32 %v939_v19, %v843_v16  ;;  %p1097_p0 = scmp.ne.s32.totalorder %s836_s4, %s1096_s2  ;;  %p1102_p2 = scmp.lt.s32.totalorder %s1096_s2, %s1096_s2 }
  0xfc   :  { %v640_v26 = vadd.f32 %v961_v20, %v600_v25  ;;  %p1103_p3 = por %p1102_p2, %p1101_p1 }
  0xfe   :  { %p1104_p4 = pnand %p1103_p3, %p1097_p0 }
 0x116   :  { %v981_v27 = vpop.f32.mrb[4].mxu0 }
 0x117   :  { %v1003_v28 = vpop.f32.mrb[4].mxu1  ;;  %v982_v29 = vpop.f32.mrb[5].mxu0 }
 0x118   :  { %v1004_v30 = vpop.f32.mrb[5].mxu1  ;;  %v983_v31 = vadd.f32 %v982_v29, %v981_v27  ;;  %v984_v33 = vpop.f32.mrb[6].mxu0 }
 0x119   :  { %v1005_v32 = vadd.f32 %v1004_v30, %v1003_v28  ;;  %v1006_v34 = vpop.f32.mrb[6].mxu1  ;;  %v985_v35 = vpop.f32.mrb[7].mxu0 }
 0x11a   :  { %v1007_v36 = vpop.f32.mrb[7].mxu1  ;;  %v680_v37 = vadd.f32 %v983_v31, %v640_v26 }
 0x11c   :  { %v720_v38 = vadd.f32 %v1005_v32, %v680_v37 }
 0x11e   :  { %v727_v40 = vmin.f32 %v720_v38, 0.0  ;;  %v726_v41 = vmax.f32 %v720_v38, 0.0 }
 0x120   :  { %v734_v42 = vmul.f32 %v732_v39, %v727_v40 }
 0x122   :  { %v735_v45 = vadd.f32 %v734_v42, %v726_v41 }
 0x124   :  { %v756_v46 = vmul.f32 %v917_v43, %v735_v45  ;;  %v741_v47 = vmul.f32 %v916_v44, %v735_v45 }
 0x126   :  { %v757_v48 = vsel %vm742_vm0, %v756_v46, 0.0  ;;  %v743_v49 = vsel %vm742_vm0, %v741_v47, 0.0 }
 0x127   :  { %758 = vadd.xlane.f32.xlu1 %v757_v48  ;;  %744 = vadd.xlane.f32.xlu0 %v743_v49 }
 0x1b4   :  { %v759_v54 = vpop.xlane.xlu1 %758  ;;  %v745_v55 = vpop.xlane.xlu0 %744 }
 0x1b5   :  { %v750_v56 = vadd.f32 %v749_v53, %v745_v55  ;;  %v760_v57 = vadd.f32 %v759_v54, %v749_v53 }
 0x1b7   :  { %v762_v58 = vmin.f32 %v750_v56, 0.0  ;;  %v774_v59 = vmin.f32 %v760_v57, 0.0  ;;  %v761_v2 = vmax.f32 %v750_v56, 0.0  ;;  %v773_v5 = vmax.f32 %v760_v57, 0.0 }
 0x1b9   :  { %764 = vrot.lane.b32.xlu1 %v762_v58, %s1121_s21 }
 0x1bd   :  { %776 = vrot.lane.b32.xlu1 %v774_v59, %s1122_s22 }
 0x22b   :  { %v765_v62 = vpop.permute.xlu1 %764 }
 0x22c   :  { %v767_v63 = vmul.f32 %v765_v62, %v749_v53 }
 0x22e   :  { %769 = vrot.lane.b32.xlu1 %v767_v63, %s1125_s23 }
 0x22f   :  { %v777_v0 = vpop.permute.xlu1 %776 }
 0x230   :  { %v779_v1 = vmul.f32 %v777_v0, %v749_v53 }
 0x232   :  { %781 = vrot.lane.b32.xlu1 %v779_v1, %s1120_s1 }
 0x2a0   :  { %v770_v3 = vpop.permute.xlu1 %769 }
 0x2a1   :  { %v772_v4 = vadd.f32 %v770_v3, %v761_v2 }
 0x2a3   :  { %788 = vperm.xlu1 %1018, %v772_v4  }
 0x2a4   :  { %v782_v6 = vpop.permute.xlu1 %781 }
 0x2a5   :  { %v784_v7 = vadd.f32 %v782_v6, %v773_v5 }
 0x2a7   :  { %799 = vperm.xlu0 %1019, %v784_v7  }
 0x322   :  { %v789_v9 = vpop.permute.xlu1 %788 }
 0x323   :  { %v795_v13 = vmul.f32 %v918_v8, %v789_v9 }
 0x326   :  { %v800_v11 = vpop.permute.xlu0 %799 }
 0x327   :  { %v806_v14 = vmul.f32 %v919_v10, %v800_v11 }
 0x329   :  { %v807_v16 = vadd.f32 %v806_v14, %v795_v13 }
 0x32b   :  { %v813_v17 = vadd.f32 %v920_v15, %v807_v16 }
 0x32d   :  { %v817_v18 = vsel %vm816_vm1, %v813_v17, -1e+30 }
 0x32e   :  { %818 = vmax.xlane.f32.xlu1 %v817_v18 }
 0x3bb   :  { %v819_v19 = vpop.xlane.xlu1 %818 }
 0x3bc   :  { %v820_v20 = vsub.f32 %v817_v18, %v819_v19 }
 0x3be   :  { %v821_v21 = vmul.f32 1.442695, %v820_v20 }
 0x3c0   :  { %1092 = vpow2.f32 %v821_v21 }
 0x3ca   :  { %v1093_v22 = vpop.eup %1092 }
 0x3cb   :  { %823 = vadd.xlane.f32.xlu1 %v1093_v22 }
 0x458   :  { %v824_v23 = vpop.xlane.xlu1 %823 }
 0x459   :  { %1094 = vlog2.f32 %v824_v23 }
 0x463   :  { %v1095_v24 = vpop.eup %1094 }
 0x464   :  { %v826_v25 = vmul.f32 0.6931472, %v1095_v24 }
 0x466   :  { %v827_v26 = vsub.f32 %v820_v20, %v826_v25 }
 0x468   :  { %828 = vst [vmem:[#allocation2] sm:$0xff] %v827_v26 }
 0x469   :  { %1107 = shalt.err (!%p1104_p4)
}
 0x46a   :  { %s1108_s7 = scalar_lea.hbm %s1389_s3, 128 }
 0x46b   :  { %p1109_p5 = scmp.ne.s32.totalorder %s1389_s3, %s1108_s7  ;;  %p1112_p6 = scmp.lt.u32.totalorder %s1108_s7, %s1389_s3 }
 0x46d   :  { %p1114_p7 = pnand %p1112_p6, %p1109_p5 }
 0x46f   :  { %1117 = shalt.err (!%p1114_p7)
}
 0x470   :  { %838 = dma.vmem_to_hbm [thread:$0]  %s836_s4, 128, %s1389_s3, [#allocation3]  }
 0x471   :  { %1118 = dma.done.wait [#allocation3], 128  }
 0x472   :  { %1119 = vsyncadd [#allocation3], 4294967168 }
 0x473   :  { %842 = vsyncpa [#allocation3], 1 }

</bundles_post_ra>
